<compile_context>
chip_gen: v7x
topology: tpu7x:2x2x1
jax: 0.10.0
libtpu: 0.0.40
codegen_flags: <defaults>
</compile_context>

<pallas_src>
import functools

import jax
import jax.numpy as jnp
from jax.experimental import pallas as pl
from jax.experimental.pallas import tpu as pltpu


def _round_up(x, m):
    return ((x + m - 1) // m) * m


def _chip_budget():
    """Return (tb_max, vmem_limit_bytes) per TPU generation.

    v5e/v6e: 128 MiB physical VMEM -> bigger batch tile, 64 MiB scoped limit.
    v7x:      64 MiB physical VMEM -> smaller tile, keep scoped limit at 32 MiB.
    """
    vmem_bytes = 64 * 1024 * 1024  # conservative (v7x-shaped) default
    try:
        info = pltpu.get_tpu_info()
        vmem_bytes = int(getattr(info, "vmem_capacity_bytes", vmem_bytes))
    except Exception:
        pass
    if vmem_bytes >= 96 * 1024 * 1024:       # v5e / v6e
        return 8192, 64 * 1024 * 1024
    return 4096, 32 * 1024 * 1024            # v7x


def mlp3_kernel(x_ref, w1_ref, b1_ref, w2_ref, b2_ref, w3_ref, b3_ref, o_ref):
    # Layer 1: Linear(1 -> H1) + ReLU.  K=1 matmul is a VPU broadcast multiply
    # ((TB,1) * (1,H1) -> (TB,H1)); no MXU push/pop for this layer.
    h = x_ref[...] * w1_ref[...] + b1_ref[...]
    h = jnp.maximum(h, 0.0)
    # Layer 2: Linear(H1 -> H2) + ReLU (MXU, f32 accumulation).
    h = jnp.dot(h, w2_ref[...], preferred_element_type=jnp.float32) + b2_ref[...]
    h = jnp.maximum(h, 0.0)
    # Layer 3: Linear(H2 -> n_out), no activation.  Narrow lane store
    # (masked vst.msk) -- still one store per 8-row slab, far less HBM traffic
    # than a 128-lane-padded output.
    o = jnp.dot(h, w3_ref[...], preferred_element_type=jnp.float32) + b3_ref[...]
    o_ref[...] = o.astype(o_ref.dtype)


@functools.partial(jax.jit, static_argnames=("n_out",))
def fully_connected_n(x, params, n_out):
    """x: (B, 1) float32; params: dict w1,b1,w2,b2,w3,b3 with w's as (in, out)."""
    w1, b1 = params["w1"], params["b1"]
    w2, b2 = params["w2"], params["b2"]
    w3, b3 = params["w3"], params["b3"]

    B = x.shape[0]
    h1 = w1.shape[1]
    h2 = w2.shape[1]
    assert w3.shape[1] == n_out

    tb_max, vmem_limit = _chip_budget()

    # Ragged batch tiling (no wrapper pad / slice).  Aim for >= 2 grid steps
    # when B is large enough so both v7x TensorCores get work.
    tb = min(tb_max, max(8, _round_up(pl.cdiv(B, 2), 8)))
    grid = (pl.cdiv(B, tb),)

    # Weights/biases: full-extent blocks, resident in VMEM across all steps.
    resident = lambda shape: pl.BlockSpec(shape, lambda i: (0, 0))

    cost = pl.CostEstimate(
        flops=2 * B * (h1 + h1 * h2 + h2 * n_out),
        transcendentals=0,
        bytes_accessed=4 * (B * (1 + n_out)
                            + 2 * h1 + h1 * h2 + h2 + h2 * n_out + n_out),
    )

    out = pl.pallas_call(
        mlp3_kernel,
        out_shape=jax.ShapeDtypeStruct((B, n_out), jnp.float32),
        grid=grid,
        in_specs=[
            pl.BlockSpec((tb, 1), lambda i: (i, 0)),     # x tile
            resident((1, h1)),                           # w1
            resident((1, h1)),                           # b1
            resident((h1, h2)),                          # w2
            resident((1, h2)),                           # b2
            resident((h2, n_out)),                       # w3
            resident((1, n_out)),                        # b3
        ],
        out_specs=pl.BlockSpec((tb, n_out), lambda i: (i, 0)),
        compiler_params=pltpu.CompilerParams(
            dimension_semantics=("parallel",),
            vmem_limit_bytes=vmem_limit,
        ),
        cost_estimate=cost,
    )(x, w1, b1, w2, b2, w3, b3)

    return out


def init_linear(key, fan_in, fan_out):
    """PyTorch-style nn.Linear init: U(-1/sqrt(fan_in), +1/sqrt(fan_in)).

    Returns W transposed to (fan_in, fan_out) and bias as (1, fan_out)."""
    kw, kb = jax.random.split(key)
    bound = 1.0 / (fan_in ** 0.5)
    w = jax.random.uniform(kw, (fan_in, fan_out), jnp.float32, -bound, bound)
    b = jax.random.uniform(kb, (1, fan_out), jnp.float32, -bound, bound)
    return w, b


def make_params(key, n, hidden_nodes=(10, 10)):
    nodes = [1] + list(hidden_nodes) + [n]
    keys = jax.random.split(key, len(nodes) - 1)
    w1, b1 = init_linear(keys[0], nodes[0], nodes[1])
    w2, b2 = init_linear(keys[1], nodes[1], nodes[2])
    w3, b3 = init_linear(keys[2], nodes[2], nodes[3])
    return {"w1": w1, "b1": b1, "w2": w2, "b2": b2, "w3": w3, "b3": b3}


def reference_forward(x, p):
    h = jnp.maximum(x @ p["w1"] + p["b1"], 0.0)
    h = jnp.maximum(h @ p["w2"] + p["b2"], 0.0)
    return h @ p["w3"] + p["b3"]


if __name__ == "__main__":
    key = jax.random.PRNGKey(0)
    k_params, k_x = jax.random.split(key)

    n = 4                      # output dimension of the final Linear
    batch = 8
    params = make_params(k_params, n=n, hidden_nodes=(10, 10))
    x = jax.random.normal(k_x, (batch, 1), dtype=jnp.float32)

    out = fully_connected_n(x, params, n_out=n)
    out = jax.block_until_ready(out)

    ref = reference_forward(x, params)
    assert out.shape == (batch, n), out.shape
    assert jnp.allclose(out, ref, atol=1e-5, rtol=1e-5), "mismatch vs reference"

    # Also exercise a ragged batch (not a multiple of the tile size; 2 steps).
    x2 = jax.random.normal(jax.random.PRNGKey(1), (37, 1), dtype=jnp.float32)
    out2 = jax.block_until_ready(fully_connected_n(x2, params, n_out=n))
    ref2 = reference_forward(x2, params)
    assert out2.shape == (37, n), out2.shape
    assert jnp.allclose(out2, ref2, atol=1e-5, rtol=1e-5), "mismatch (ragged batch)"

    print("KERNEL_OK")
</pallas_src>

<mosaic_0001>
module attributes {stable_mosaic.version = 11 : i64} {
  func.func @mlp3_kernel(%arg0: i32, %arg1: memref<8x1xf32, #tpu.memory_space<vmem>>, %arg2: memref<1x10xf32, #tpu.memory_space<vmem>>, %arg3: memref<1x10xf32, #tpu.memory_space<vmem>>, %arg4: memref<10x10xf32, #tpu.memory_space<vmem>>, %arg5: memref<1x10xf32, #tpu.memory_space<vmem>>, %arg6: memref<10x4xf32, #tpu.memory_space<vmem>>, %arg7: memref<1x4xf32, #tpu.memory_space<vmem>>, %arg8: memref<8x4xf32, #tpu.memory_space<vmem>>) attributes {dimension_semantics = [#tpu.dimension_semantics<parallel>], iteration_bounds = array<i64: 1>, scalar_prefetch = 0 : i64, scratch_operands = 0 : i64, tpu.core_type = #tpu.core_type<tc>, window_params = [{transform_indices = @transform_0, window_bounds = array<i64: 8, 1>}, {pipeline_mode = #tpu.pipeline_mode<synchronous>, transform_indices = @transform_1, window_bounds = array<i64: 1, 10>}, {pipeline_mode = #tpu.pipeline_mode<synchronous>, transform_indices = @transform_2, window_bounds = array<i64: 1, 10>}, {pipeline_mode = #tpu.pipeline_mode<synchronous>, transform_indices = @transform_3, window_bounds = array<i64: 10, 10>}, {pipeline_mode = #tpu.pipeline_mode<synchronous>, transform_indices = @transform_4, window_bounds = array<i64: 1, 10>}, {pipeline_mode = #tpu.pipeline_mode<synchronous>, transform_indices = @transform_5, window_bounds = array<i64: 10, 4>}, {pipeline_mode = #tpu.pipeline_mode<synchronous>, transform_indices = @transform_6, window_bounds = array<i64: 1, 4>}, {transform_indices = @transform_7, window_bounds = array<i64: 8, 4>}]} {
    %c0 = arith.constant 0 : index
    %c0_0 = arith.constant 0 : index
    %0 = vector.load %arg1[%c0, %c0_0] : memref<8x1xf32, #tpu.memory_space<vmem>>, vector<8x1xf32>
    %c0_1 = arith.constant 0 : index
    %c0_2 = arith.constant 0 : index
    %1 = vector.load %arg2[%c0_1, %c0_2] : memref<1x10xf32, #tpu.memory_space<vmem>>, vector<1x10xf32>
    %2 = vector.broadcast %0 : vector<8x1xf32> to vector<8x10xf32>
    %3 = vector.broadcast %1 : vector<1x10xf32> to vector<8x10xf32>
    %4 = arith.mulf %2, %3 : vector<8x10xf32>
    %c0_3 = arith.constant 0 : index
    %c0_4 = arith.constant 0 : index
    %5 = vector.load %arg3[%c0_3, %c0_4] : memref<1x10xf32, #tpu.memory_space<vmem>>, vector<1x10xf32>
    %6 = vector.broadcast %5 : vector<1x10xf32> to vector<8x10xf32>
    %7 = arith.addf %4, %6 : vector<8x10xf32>
    %cst = arith.constant 0.000000e+00 : f32
    %8 = vector.broadcast %cst : f32 to vector<8x10xf32>
    %9 = arith.maximumf %7, %8 : vector<8x10xf32>
    %c0_5 = arith.constant 0 : index
    %c0_6 = arith.constant 0 : index
    %10 = vector.load %arg4[%c0_5, %c0_6] : memref<10x10xf32, #tpu.memory_space<vmem>>, vector<10x10xf32>
    %cst_7 = arith.constant dense<0.000000e+00> : vector<8x10xf32>
    %11 = tpu.matmul %9, %10, %cst_7 {dimension_numbers = #tpu.dot_dimension_numbers<[1], [0], [0], [1], [0, 0, 1, 1], [], []>} : vector<8x10xf32>, vector<10x10xf32>, vector<8x10xf32> -> vector<8x10xf32>
    %c0_8 = arith.constant 0 : index
    %c0_9 = arith.constant 0 : index
    %12 = vector.load %arg5[%c0_8, %c0_9] : memref<1x10xf32, #tpu.memory_space<vmem>>, vector<1x10xf32>
    %13 = vector.broadcast %12 : vector<1x10xf32> to vector<8x10xf32>
    %14 = arith.addf %11, %13 : vector<8x10xf32>
    %cst_10 = arith.constant 0.000000e+00 : f32
    %15 = vector.broadcast %cst_10 : f32 to vector<8x10xf32>
    %16 = arith.maximumf %14, %15 : vector<8x10xf32>
    %c0_11 = arith.constant 0 : index
    %c0_12 = arith.constant 0 : index
    %17 = vector.load %arg6[%c0_11, %c0_12] : memref<10x4xf32, #tpu.memory_space<vmem>>, vector<10x4xf32>
    %cst_13 = arith.constant dense<0.000000e+00> : vector<8x4xf32>
    %18 = tpu.matmul %16, %17, %cst_13 {dimension_numbers = #tpu.dot_dimension_numbers<[1], [0], [0], [1], [0, 0, 1, 1], [], []>} : vector<8x10xf32>, vector<10x4xf32>, vector<8x4xf32> -> vector<8x4xf32>
    %c0_14 = arith.constant 0 : index
    %c0_15 = arith.constant 0 : index
    %19 = vector.load %arg7[%c0_14, %c0_15] : memref<1x4xf32, #tpu.memory_space<vmem>>, vector<1x4xf32>
    %20 = vector.broadcast %19 : vector<1x4xf32> to vector<8x4xf32>
    %21 = arith.addf %18, %20 : vector<8x4xf32>
    %c0_16 = arith.constant 0 : index
    %c0_17 = arith.constant 0 : index
    %22 = vector.load %arg8[%c0_16, %c0_17] : memref<8x4xf32, #tpu.memory_space<vmem>>, vector<8x4xf32>
    tpu.vector_store %arg8[%c0_16, %c0_17], %21 {strides = array<i32>} : memref<8x4xf32, #tpu.memory_space<vmem>>, vector<8x4xf32>,
    return
  }
  func.func @transform_0(%arg0: i32) -> (i32, i32) {
    %c0_i32 = arith.constant 0 : i32
    %c0_i32_0 = arith.constant 0 : i32
    return %arg0, %c0_i32 : i32, i32
  }
  func.func @transform_1(%arg0: i32) -> (i32, i32) {
    %c0_i32 = arith.constant 0 : i32
    %c0_i32_0 = arith.constant 0 : i32
    %c0_i32_1 = arith.constant 0 : i32
    return %c0_i32, %c0_i32_0 : i32, i32
  }
  func.func @transform_2(%arg0: i32) -> (i32, i32) {
    %c0_i32 = arith.constant 0 : i32
    %c0_i32_0 = arith.constant 0 : i32
    %c0_i32_1 = arith.constant 0 : i32
    return %c0_i32, %c0_i32_0 : i32, i32
  }
  func.func @transform_3(%arg0: i32) -> (i32, i32) {
    %c0_i32 = arith.constant 0 : i32
    %c0_i32_0 = arith.constant 0 : i32
    %c0_i32_1 = arith.constant 0 : i32
    return %c0_i32, %c0_i32_0 : i32, i32
  }
  func.func @transform_4(%arg0: i32) -> (i32, i32) {
    %c0_i32 = arith.constant 0 : i32
    %c0_i32_0 = arith.constant 0 : i32
    %c0_i32_1 = arith.constant 0 : i32
    return %c0_i32, %c0_i32_0 : i32, i32
  }
  func.func @transform_5(%arg0: i32) -> (i32, i32) {
    %c0_i32 = arith.constant 0 : i32
    %c0_i32_0 = arith.constant 0 : i32
    %c0_i32_1 = arith.constant 0 : i32
    return %c0_i32, %c0_i32_0 : i32, i32
  }
  func.func @transform_6(%arg0: i32) -> (i32, i32) {
    %c0_i32 = arith.constant 0 : i32
    %c0_i32_0 = arith.constant 0 : i32
    %c0_i32_1 = arith.constant 0 : i32
    return %c0_i32, %c0_i32_0 : i32, i32
  }
  func.func @transform_7(%arg0: i32) -> (i32, i32) {
    %c0_i32 = arith.constant 0 : i32
    %c0_i32_0 = arith.constant 0 : i32
    return %arg0, %c0_i32 : i32, i32
  }
}

</mosaic_0001>

<bundles_post_ra>
// kernel: fully_connected_n.1
= control target key start
LH: loop header
LB: loop body
LE: loop exit
PB: predicated region body
PF: predicated region fallthrough
CT: control target
= control target key end

     0   :  { %v270_v0 = vmov 0   ;;  %vm62_vm0 = vcmask 1041408   ;;  %v271_v5 = vmov 0.0|0.0   ;;  %vm272_vm1 = vmmov 1   ;;  %s353_s0 = inlined_call_operand.vmem [shape: f32[8,1], index: 0, kind: input, shape index: {}]   ;;  %s354_s3 = inlined_call_operand.vmem [shape: f32[10,10], index: 3, kind: input, shape index: {}]   ;;  %s355_s1 = inlined_call_operand.vmem [shape: f32[1,10], index: 1, kind: input, shape index: {}]   ;;  %s356_s2 = inlined_call_operand.vmem [shape: f32[1,10], index: 2, kind: input, shape index: {}]   ;;  %s357_s5 = inlined_call_operand.vmem [shape: f32[10,4], index: 5, kind: input, shape index: {}]   ;;  %s358_s4 = inlined_call_operand.vmem [shape: f32[1,10], index: 4, kind: input, shape index: {}]   ;;  %s359_s6 = inlined_call_operand.vmem [shape: f32[1,4], index: 6, kind: input, shape index: {}]   ;;  %s360_s7 = inlined_call_operand.vmem [shape: f32[8,4], index: 7, kind: output, shape index: {}]  }
   0x1   :  { %269 = vset.pattern.permute.xlu0 %v270_v0  ;;  %v26_v1 = vld [vmem:[%s353_s0] sm:$0xff]  ;;  %v50_v3 = vld [vmem:[%s354_s3 + $0x8] sm:$0x3]  ;;  %256 = vmatprep.subr.bf16.mxu0 %v271_v5  ;;  %vm324_vm2 = vmpackc.low %vm62_vm0, %vm272_vm1  ;;  %vm273_vm3 = vmmov 0   ;;  %v274_v7 = vmov 0.0   ;;  %vm58_vm4 = vcmask 80896  }
   0x2   :  { %30 = vperm.xlu0 %269, %v26_v1   ;;  %v49_v2 = vld [vmem:[%s354_s3] sm:$0xff]  ;;  %260 = vmatprep.subr.bf16.mxu1 %v271_v5  ;;  %v138_v15 = vld [vmem:[%s357_s5 + $0x8] sm:$0x3]  ;;  %vm222_vm5 = vcmask 31744  }
   0x3   :  { %v257_v4 = vpack.c.bf16 %v50_v3, %v49_v2  ;;  %246 = vmatprep.mubr.msk.f32.mxu0 %vm273_vm3, %v274_v7  ;;  %253 = vmatprep.mubr.msk.f32.mxu1 %vm273_vm3, %v274_v7  ;;  %v228_v8 = vld [vmem:[%s355_s1] ss:$0 sm:$0xff] }
   0x4   :  { %v229_v9 = vld [vmem:[%s356_s2] ss:$0 sm:$0xff] }
   0x5   :  { %259 = vmatpush3.bf16.msk.msra.mxu0 %vm324_vm2, %v257_v4  ;;  %v137_v14 = vld [vmem:[%s357_s5] sm:$0xff] }
   0x6   :  { %v261_v16 = vpack.c.bf16 %v138_v15, %v137_v14  ;;  %v230_v17 = vld [vmem:[%s358_s4] ss:$0 sm:$0xff] }
   0x7   :  { %v233_v22 = vld [vmem:[%s359_s6] ss:$0 sm:$0xff] }
   0x8   :  { %263 = vmatpush3.bf16.msk.msra.mxu1 %vm324_vm2, %v261_v16 }
  0x81   :  { %v31_v10 = vpop.permute.xlu0 %30 }
  0x82   :  { %v39_v11 = vmul.f32 %v228_v8, %v31_v10 }
  0x84   :  { %v47_v12 = vadd.f32 %v229_v9, %v39_v11 }
  0x86   :  { %v48_v13 = vmax.f32 %v47_v12, 0.0 }
  0x88   :  { %247 = vmatmul.mubr.msk.f32.vlgmr.msra.gmra.mrb[0].mxu0 %vm58_vm4, %v48_v13 }
 0x15b   :  { %v132_v18 = vpop.f32.mrb[0].mxu0 }
 0x15c   :  { %v133_v19 = vadd.f32 %v230_v17, %v132_v18  ;;  %v248_v20 = vpop.f32.mrb[1].mxu0 }
 0x15e   :  { %v136_v21 = vmax.f32 %v133_v19, 0.0 }
 0x160   :  { %254 = vmatmul.mubr.msk.f32.vlgmr.msra.gmra.mrb[0].mxu1 %vm58_vm4, %v136_v21 }
 0x233   :  { %v218_v23 = vpop.f32.mrb[0].mxu1 }
 0x234   :  { %v219_v24 = vadd.f32 %v233_v22, %v218_v23  ;;  %v255_v25 = vpop.f32.mrb[1].mxu1 }
 0x236   :  { %223 = vst.msk [vmem:[%s360_s7] sm:$0xff] %vm222_vm5, %v219_v24 }

</bundles_post_ra>
